<compile_context>
chip_gen: v7x
topology: tpu7x:2x2x1
jax: 0.10.0
libtpu: 0.0.40
codegen_flags: <defaults>
</compile_context>

<pallas_src>
import jax
import jax.numpy as jnp
from jax import lax
from jax.experimental import pallas as pl
from jax.experimental.pallas import tpu as pltpu

# ---------------------------------------------------------------------------
# Model configuration (small, consistent with the module's constructor args)
# ---------------------------------------------------------------------------
B = 2            # batch
S = 8            # sequence length
D_MOLECULE = 16
D_TEXT = 32
D_MODEL = 32     # attention output dim == fp_dim of ValueMLP
N_LAYERS = 2     # ValueMLP n_layers (1 input layer + 1 hidden layer)
LATENT = 32
DROPOUT = 0.1    # TODO(synk): nn.Dropout is identity at inference; not applied in kernel.

BS = B * S
INV_SCALE = 1.0 / float(D_MODEL) ** 0.5
B_REST_LEN = D_MODEL + 2 * LATENT + 1   # [b_V | b1 | b2 | b3] packed -> 97


def fusion_kernel(text_ref, mol_ref,
                  wqk_ref, bqk_ref, wv_ref,
                  w1_ref, w2_ref, w3t_ref, brest_ref,
                  out_ref):
    """Single invocation: whole batch, all compute in VMEM / f32."""
    text = text_ref[...]                       # (BS, D_TEXT)
    mol = mol_ref[...]                         # (BS, D_MOLECULE)
    brest = brest_ref[...]                     # (1, 97) packed biases

    b_v = brest[:, :D_MODEL]
    b_1 = brest[:, D_MODEL:D_MODEL + LATENT]
    b_2 = brest[:, D_MODEL + LATENT:D_MODEL + 2 * LATENT]
    b_3 = brest[:, D_MODEL + 2 * LATENT:]      # (1, 1)

    # --- fused Q|K projection (one MXU push) + V projection ---
    qk = jnp.dot(text, wqk_ref[...], preferred_element_type=jnp.float32) + bqk_ref[...]
    v = jnp.dot(mol, wv_ref[...], preferred_element_type=jnp.float32) + b_v

    q = qk[:, :D_MODEL]                        # (BS, D_MODEL)
    k = qk[:, D_MODEL:]                        # (BS, D_MODEL)

    # --- per-batch attention (B=2, static unroll; tiny (S,S) problems) ---
    fused_rows = []
    for b in range(B):
        lo = b * S
        q_b = q[lo:lo + S, :]
        k_b = k[lo:lo + S, :]
        v_b = v[lo:lo + S, :]
        # Q K^T without materializing a transpose: contract feature axes.
        s_b = lax.dot_general(q_b, k_b, (((1,), (1,)), ((), ())),
                              preferred_element_type=jnp.float32) * INV_SCALE
        m = jnp.max(s_b, axis=-1, keepdims=True)
        e = jnp.exp(s_b - m)
        denom = jnp.sum(e, axis=-1, keepdims=True)
        attn = e * pl.reciprocal(denom, approx=False)
        fused_rows.append(jnp.dot(attn, v_b, preferred_element_type=jnp.float32))
    fused = jnp.concatenate(fused_rows, axis=0)            # (BS, D_MODEL)

    # --- ValueMLP: fp->latent, latent->latent, latent->1 ---
    h = jnp.dot(fused, w1_ref[...], preferred_element_type=jnp.float32) + b_1
    h = jnp.maximum(h, 0.0)
    h = jnp.dot(h, w2_ref[...], preferred_element_type=jnp.float32) + b_2
    h = jnp.maximum(h, 0.0)

    # Output head computed as (1, LATENT) x (BS, LATENT)^T -> (1, BS): lane-dense output.
    y = lax.dot_general(w3t_ref[...], h, (((1,), (1,)), ((), ())),
                        preferred_element_type=jnp.float32) + b_3     # (1, BS)

    # Numerically stable softplus == log(1 + exp(y)).
    out_ref[...] = jnp.maximum(y, 0.0) + jnp.log(1.0 + jnp.exp(-jnp.abs(y)))


# ---------------------------------------------------------------------------
# Parameter handling
# ---------------------------------------------------------------------------
def init_params(key):
    """torch.nn.Linear-style uniform(-1/sqrt(in), 1/sqrt(in)); weights stored [in, out]."""
    def linear(k, d_in, d_out):
        kw, kb = jax.random.split(k)
        bound = 1.0 / jnp.sqrt(jnp.float32(d_in))
        w = jax.random.uniform(kw, (d_in, d_out), jnp.float32, -bound, bound)
        b = jax.random.uniform(kb, (1, d_out), jnp.float32, -bound, bound)
        return w, b

    keys = jax.random.split(key, 6)
    wq, bq = linear(keys[0], D_TEXT, D_MODEL)
    wk, bk = linear(keys[1], D_TEXT, D_MODEL)
    wv, bv = linear(keys[2], D_MOLECULE, D_MODEL)
    w1, b1 = linear(keys[3], D_MODEL, LATENT)
    w2, b2 = linear(keys[4], LATENT, LATENT)
    w3, b3 = linear(keys[5], LATENT, 1)
    return (wq, bq, wk, bk, wv, bv, w1, b1, w2, b2, w3, b3)


def pack_params(params):
    """Pack params for the kernel: fuse Q|K weights/biases, pack small biases, transpose head."""
    (wq, bq, wk, bk, wv, bv, w1, b1, w2, b2, w3, b3) = params
    w_qk = jnp.concatenate([wq, wk], axis=1)               # (D_TEXT, 2*D_MODEL)
    b_qk = jnp.concatenate([bq, bk], axis=1)               # (1, 2*D_MODEL)
    w3t = w3.T                                             # (1, LATENT)
    b_rest = jnp.concatenate([bv, b1, b2, b3], axis=1)     # (1, 97)
    return (w_qk, b_qk, wv, w1, w2, w3t, b_rest)


# ---------------------------------------------------------------------------
# Forward wrappers
# ---------------------------------------------------------------------------
def fusion_model_forward(molecule_embedding, text_embedding, packed_params):
    (w_qk, b_qk, w_v, w1, w2, w3t, b_rest) = packed_params

    # Layout plumbing only (free XLA reshapes): flatten batch*seq for the matmuls.
    text2d = text_embedding.reshape(BS, D_TEXT)
    mol2d = molecule_embedding.reshape(BS, D_MOLECULE)

    vmem = lambda: pl.BlockSpec(memory_space=pltpu.MemorySpace.VMEM)

    out = pl.pallas_call(
        fusion_kernel,
        out_shape=jax.ShapeDtypeStruct((1, BS), jnp.float32),
        in_specs=[vmem() for _ in range(9)],
        out_specs=vmem(),
    )(text2d, mol2d, w_qk, b_qk, w_v, w1, w2, w3t, b_rest)

    return out.reshape(B, S, 1)


def reference_forward(molecule_embedding, text_embedding, params):
    """Pure-JAX reference mirroring the PyTorch forward."""
    (wq, bq, wk, bk, wv, bv, w1, b1, w2, b2, w3, b3) = params
    q = text_embedding @ wq + bq
    k = text_embedding @ wk + bk
    v = molecule_embedding @ wv + bv
    scores = (q @ jnp.swapaxes(k, -2, -1)) / jnp.sqrt(jnp.float32(D_MODEL))
    attn = jax.nn.softmax(scores, axis=-1)
    fused = attn @ v
    h = jnp.maximum(fused @ w1 + b1, 0.0)
    h = jnp.maximum(h @ w2 + b2, 0.0)
    y = h @ w3 + b3
    # torch module does log(1+exp(x)); inputs here are small so this matches the
    # kernel's numerically stable form to well within tolerance.
    return jnp.log(1.0 + jnp.exp(y))


if __name__ == "__main__":
    key = jax.random.PRNGKey(0)
    k_mol, k_text, k_params = jax.random.split(key, 3)

    molecule_embedding = jax.random.normal(k_mol, (B, S, D_MOLECULE), jnp.float32)
    text_embedding = jax.random.normal(k_text, (B, S, D_TEXT), jnp.float32)
    params = init_params(k_params)
    packed = pack_params(params)

    out = fusion_model_forward(molecule_embedding, text_embedding, packed)
    out = jax.block_until_ready(out)

    ref = reference_forward(molecule_embedding, text_embedding, params)
    assert out.shape == (B, S, 1)
    assert jnp.allclose(out, ref, atol=1e-5, rtol=1e-5), "mismatch vs reference"

    print("KERNEL_OK")
</pallas_src>

<mosaic_0001>
module attributes {stable_mosaic.version = 11 : i64} {
  func.func @fusion_kernel(%arg0: memref<16x32xf32, #tpu.memory_space<vmem>>, %arg1: memref<16x16xf32, #tpu.memory_space<vmem>>, %arg2: memref<32x64xf32, #tpu.memory_space<vmem>>, %arg3: memref<1x64xf32, #tpu.memory_space<vmem>>, %arg4: memref<16x32xf32, #tpu.memory_space<vmem>>, %arg5: memref<32x32xf32, #tpu.memory_space<vmem>>, %arg6: memref<32x32xf32, #tpu.memory_space<vmem>>, %arg7: memref<1x32xf32, #tpu.memory_space<vmem>>, %arg8: memref<1x97xf32, #tpu.memory_space<vmem>>, %arg9: memref<1x16xf32, #tpu.memory_space<vmem>>) attributes {dimension_semantics = [], scalar_prefetch = 0 : i64, scratch_operands = 0 : i64, tpu.core_type = #tpu.core_type<tc>} {
    %c0 = arith.constant 0 : index
    %c0_0 = arith.constant 0 : index
    %0 = vector.load %arg0[%c0, %c0_0] : memref<16x32xf32, #tpu.memory_space<vmem>>, vector<16x32xf32>
    %c0_1 = arith.constant 0 : index
    %c0_2 = arith.constant 0 : index
    %1 = vector.load %arg1[%c0_1, %c0_2] : memref<16x16xf32, #tpu.memory_space<vmem>>, vector<16x16xf32>
    %c0_3 = arith.constant 0 : index
    %c0_4 = arith.constant 0 : index
    %2 = vector.load %arg8[%c0_3, %c0_4] : memref<1x97xf32, #tpu.memory_space<vmem>>, vector<1x97xf32>
    %3 = vector.extract_strided_slice %2 {offsets = [0, 0], sizes = [1, 32], strides = [1, 1]} : vector<1x97xf32> to vector<1x32xf32>
    %4 = vector.extract_strided_slice %2 {offsets = [0, 32], sizes = [1, 32], strides = [1, 1]} : vector<1x97xf32> to vector<1x32xf32>
    %5 = vector.extract_strided_slice %2 {offsets = [0, 64], sizes = [1, 32], strides = [1, 1]} : vector<1x97xf32> to vector<1x32xf32>
    %6 = vector.extract_strided_slice %2 {offsets = [0, 96], sizes = [1, 1], strides = [1, 1]} : vector<1x97xf32> to vector<1x1xf32>
    %c0_5 = arith.constant 0 : index
    %c0_6 = arith.constant 0 : index
    %7 = vector.load %arg2[%c0_5, %c0_6] : memref<32x64xf32, #tpu.memory_space<vmem>>, vector<32x64xf32>
    %cst = arith.constant dense<0.000000e+00> : vector<16x64xf32>
    %8 = tpu.matmul %0, %7, %cst {dimension_numbers = #tpu.dot_dimension_numbers<[1], [0], [0], [1], [0, 0, 1, 1], [], []>} : vector<16x32xf32>, vector<32x64xf32>, vector<16x64xf32> -> vector<16x64xf32>
    %c0_7 = arith.constant 0 : index
    %c0_8 = arith.constant 0 : index
    %9 = vector.load %arg3[%c0_7, %c0_8] : memref<1x64xf32, #tpu.memory_space<vmem>>, vector<1x64xf32>
    %10 = vector.broadcast %9 : vector<1x64xf32> to vector<16x64xf32>
    %11 = arith.addf %8, %10 : vector<16x64xf32>
    %c0_9 = arith.constant 0 : index
    %c0_10 = arith.constant 0 : index
    %12 = vector.load %arg4[%c0_9, %c0_10] : memref<16x32xf32, #tpu.memory_space<vmem>>, vector<16x32xf32>
    %cst_11 = arith.constant dense<0.000000e+00> : vector<16x32xf32>
    %13 = tpu.matmul %1, %12, %cst_11 {dimension_numbers = #tpu.dot_dimension_numbers<[1], [0], [0], [1], [0, 0, 1, 1], [], []>} : vector<16x16xf32>, vector<16x32xf32>, vector<16x32xf32> -> vector<16x32xf32>
    %14 = vector.broadcast %3 : vector<1x32xf32> to vector<16x32xf32>
    %15 = arith.addf %13, %14 : vector<16x32xf32>
    %16 = vector.extract_strided_slice %11 {offsets = [0, 0], sizes = [16, 32], strides = [1, 1]} : vector<16x64xf32> to vector<16x32xf32>
    %17 = vector.extract_strided_slice %11 {offsets = [0, 32], sizes = [16, 32], strides = [1, 1]} : vector<16x64xf32> to vector<16x32xf32>
    %18 = vector.extract_strided_slice %16 {offsets = [0, 0], sizes = [8, 32], strides = [1, 1]} : vector<16x32xf32> to vector<8x32xf32>
    %19 = vector.extract_strided_slice %17 {offsets = [0, 0], sizes = [8, 32], strides = [1, 1]} : vector<16x32xf32> to vector<8x32xf32>
    %20 = vector.extract_strided_slice %15 {offsets = [0, 0], sizes = [8, 32], strides = [1, 1]} : vector<16x32xf32> to vector<8x32xf32>
    %cst_12 = arith.constant dense<0.000000e+00> : vector<8x8xf32>
    %21 = tpu.matmul %18, %19, %cst_12 {dimension_numbers = #tpu.dot_dimension_numbers<[1], [1], [0], [0], [0, 0, 1, 0], [], []>} : vector<8x32xf32>, vector<8x32xf32>, vector<8x8xf32> -> vector<8x8xf32>
    %cst_13 = arith.constant 0.176776692 : f32
    %22 = vector.broadcast %cst_13 : f32 to vector<8x8xf32>
    %23 = arith.mulf %21, %22 : vector<8x8xf32>
    %cst_14 = arith.constant dense<0xFF800000> : vector<8xf32>
    %24 = vector.multi_reduction <maximumf>, %23, %cst_14 [1] : vector<8x8xf32> to vector<8xf32>
    %25 = vector.shape_cast %24 : vector<8xf32> to vector<8x1xf32>
    %26 = vector.broadcast %25 : vector<8x1xf32> to vector<8x8xf32>
    %27 = arith.subf %23, %26 : vector<8x8xf32>
    %28 = math.exp %27 : vector<8x8xf32>
    %cst_15 = arith.constant dense<0.000000e+00> : vector<8xf32>
    %29 = vector.multi_reduction <add>, %28, %cst_15 [1] : vector<8x8xf32> to vector<8xf32>
    %30 = vector.shape_cast %29 : vector<8xf32> to vector<8x1xf32>
    %31 = tpu.reciprocal %30 : vector<8x1xf32> -> vector<8x1xf32>
    %32 = vector.broadcast %31 : vector<8x1xf32> to vector<8x8xf32>
    %33 = arith.mulf %28, %32 : vector<8x8xf32>
    %cst_16 = arith.constant dense<0.000000e+00> : vector<8x32xf32>
    %34 = tpu.matmul %33, %20, %cst_16 {dimension_numbers = #tpu.dot_dimension_numbers<[1], [0], [0], [1], [0, 0, 1, 1], [], []>} : vector<8x8xf32>, vector<8x32xf32>, vector<8x32xf32> -> vector<8x32xf32>
    %35 = vector.extract_strided_slice %16 {offsets = [8, 0], sizes = [8, 32], strides = [1, 1]} : vector<16x32xf32> to vector<8x32xf32>
    %36 = vector.extract_strided_slice %17 {offsets = [8, 0], sizes = [8, 32], strides = [1, 1]} : vector<16x32xf32> to vector<8x32xf32>
    %37 = vector.extract_strided_slice %15 {offsets = [8, 0], sizes = [8, 32], strides = [1, 1]} : vector<16x32xf32> to vector<8x32xf32>
    %cst_17 = arith.constant dense<0.000000e+00> : vector<8x8xf32>
    %38 = tpu.matmul %35, %36, %cst_17 {dimension_numbers = #tpu.dot_dimension_numbers<[1], [1], [0], [0], [0, 0, 1, 0], [], []>} : vector<8x32xf32>, vector<8x32xf32>, vector<8x8xf32> -> vector<8x8xf32>
    %cst_18 = arith.constant 0.176776692 : f32
    %39 = vector.broadcast %cst_18 : f32 to vector<8x8xf32>
    %40 = arith.mulf %38, %39 : vector<8x8xf32>
    %cst_19 = arith.constant dense<0xFF800000> : vector<8xf32>
    %41 = vector.multi_reduction <maximumf>, %40, %cst_19 [1] : vector<8x8xf32> to vector<8xf32>
    %42 = vector.shape_cast %41 : vector<8xf32> to vector<8x1xf32>
    %43 = vector.broadcast %42 : vector<8x1xf32> to vector<8x8xf32>
    %44 = arith.subf %40, %43 : vector<8x8xf32>
    %45 = math.exp %44 : vector<8x8xf32>
    %cst_20 = arith.constant dense<0.000000e+00> : vector<8xf32>
    %46 = vector.multi_reduction <add>, %45, %cst_20 [1] : vector<8x8xf32> to vector<8xf32>
    %47 = vector.shape_cast %46 : vector<8xf32> to vector<8x1xf32>
    %48 = tpu.reciprocal %47 : vector<8x1xf32> -> vector<8x1xf32>
    %49 = vector.broadcast %48 : vector<8x1xf32> to vector<8x8xf32>
    %50 = arith.mulf %45, %49 : vector<8x8xf32>
    %cst_21 = arith.constant dense<0.000000e+00> : vector<8x32xf32>
    %51 = tpu.matmul %50, %37, %cst_21 {dimension_numbers = #tpu.dot_dimension_numbers<[1], [0], [0], [1], [0, 0, 1, 1], [], []>} : vector<8x8xf32>, vector<8x32xf32>, vector<8x32xf32> -> vector<8x32xf32>
    %52 = tpu.concatenate %34, %51 in 0 : vector<8x32xf32>, vector<8x32xf32> -> vector<16x32xf32>
    %c0_22 = arith.constant 0 : index
    %c0_23 = arith.constant 0 : index
    %53 = vector.load %arg5[%c0_22, %c0_23] : memref<32x32xf32, #tpu.memory_space<vmem>>, vector<32x32xf32>
    %cst_24 = arith.constant dense<0.000000e+00> : vector<16x32xf32>
    %54 = tpu.matmul %52, %53, %cst_24 {dimension_numbers = #tpu.dot_dimension_numbers<[1], [0], [0], [1], [0, 0, 1, 1], [], []>} : vector<16x32xf32>, vector<32x32xf32>, vector<16x32xf32> -> vector<16x32xf32>
    %55 = vector.broadcast %4 : vector<1x32xf32> to vector<16x32xf32>
    %56 = arith.addf %54, %55 : vector<16x32xf32>
    %cst_25 = arith.constant 0.000000e+00 : f32
    %57 = vector.broadcast %cst_25 : f32 to vector<16x32xf32>
    %58 = arith.maximumf %56, %57 : vector<16x32xf32>
    %c0_26 = arith.constant 0 : index
    %c0_27 = arith.constant 0 : index
    %59 = vector.load %arg6[%c0_26, %c0_27] : memref<32x32xf32, #tpu.memory_space<vmem>>, vector<32x32xf32>
    %cst_28 = arith.constant dense<0.000000e+00> : vector<16x32xf32>
    %60 = tpu.matmul %58, %59, %cst_28 {dimension_numbers = #tpu.dot_dimension_numbers<[1], [0], [0], [1], [0, 0, 1, 1], [], []>} : vector<16x32xf32>, vector<32x32xf32>, vector<16x32xf32> -> vector<16x32xf32>
    %61 = vector.broadcast %5 : vector<1x32xf32> to vector<16x32xf32>
    %62 = arith.addf %60, %61 : vector<16x32xf32>
    %cst_29 = arith.constant 0.000000e+00 : f32
    %63 = vector.broadcast %cst_29 : f32 to vector<16x32xf32>
    %64 = arith.maximumf %62, %63 : vector<16x32xf32>
    %c0_30 = arith.constant 0 : index
    %c0_31 = arith.constant 0 : index
    %65 = vector.load %arg7[%c0_30, %c0_31] : memref<1x32xf32, #tpu.memory_space<vmem>>, vector<1x32xf32>
    %cst_32 = arith.constant dense<0.000000e+00> : vector<1x16xf32>
    %66 = tpu.matmul %65, %64, %cst_32 {dimension_numbers = #tpu.dot_dimension_numbers<[1], [1], [0], [0], [0, 0, 1, 0], [], []>} : vector<1x32xf32>, vector<16x32xf32>, vector<1x16xf32> -> vector<1x16xf32>
    %67 = vector.broadcast %6 : vector<1x1xf32> to vector<1x16xf32>
    %68 = arith.addf %66, %67 : vector<1x16xf32>
    %cst_33 = arith.constant 0.000000e+00 : f32
    %69 = vector.broadcast %cst_33 : f32 to vector<1x16xf32>
    %70 = arith.maximumf %68, %69 : vector<1x16xf32>
    %71 = math.absf %68 : vector<1x16xf32>
    %cst_34 = arith.constant 0.000000e+00 : f32
    %72 = vector.broadcast %cst_34 : f32 to vector<1x16xf32>
    %73 = arith.subf %72, %71 : vector<1x16xf32>
    %74 = math.exp %73 : vector<1x16xf32>
    %cst_35 = arith.constant 1.000000e+00 : f32
    %75 = vector.broadcast %cst_35 : f32 to vector<1x16xf32>
    %76 = arith.addf %75, %74 : vector<1x16xf32>
    %77 = math.log %76 : vector<1x16xf32>
    %78 = arith.addf %70, %77 : vector<1x16xf32>
    %c0_36 = arith.constant 0 : index
    %c0_37 = arith.constant 0 : index
    %79 = vector.load %arg9[%c0_36, %c0_37] : memref<1x16xf32, #tpu.memory_space<vmem>>, vector<1x16xf32>
    tpu.vector_store %arg9[%c0_36, %c0_37], %78 {strides = array<i32>} : memref<1x16xf32, #tpu.memory_space<vmem>>, vector<1x16xf32>,
    return
  }
}

</mosaic_0001>

<bundles_post_ra>
// kernel: tpu_custom_call.1
= control target key start
LH: loop header
LB: loop body
LE: loop exit
PB: predicated region body
PF: predicated region fallthrough
CT: control target
= control target key end

     0   :  { %14 = vsyncpa [#allocation3], 0  ;;  %s1518_s0 = inlined_call_operand.hbm [shape: f32[16,32], index: 0, kind: input, shape index: {}]   ;;  %s1519_s1 = inlined_call_operand.hbm [shape: f32[16,16], index: 1, kind: input, shape index: {}]   ;;  %s1520_s2 = inlined_call_operand.hbm [shape: f32[32,64], index: 2, kind: input, shape index: {}]   ;;  %s1521_s3 = inlined_call_operand.vmem [shape: f32[1,64], index: 3, kind: input, shape index: {}]   ;;  %s1522_s4 = inlined_call_operand.hbm [shape: f32[16,32], index: 4, kind: input, shape index: {}]   ;;  %s1523_s5 = inlined_call_operand.hbm [shape: f32[32,32], index: 5, kind: input, shape index: {}]   ;;  %s1524_s6 = inlined_call_operand.hbm [shape: f32[32,32], index: 6, kind: input, shape index: {}]   ;;  %s1525_s7 = inlined_call_operand.vmem [shape: f32[1,32], index: 7, kind: input, shape index: {}]   ;;  %s1526_s8 = inlined_call_operand.vmem [shape: f32[1,97], index: 8, kind: input, shape index: {}]   ;;  %s1527_s9 = inlined_call_operand.hbm [shape: f32[1,16], index: 9, kind: output, shape index: {}]  }
   0x1   :  { %15 = vsyncpa [#allocation6], 0 }
   0x2   :  { %16 = vsyncpa [#allocation9], 0 }
   0x3   :  { %17 = vsyncpa [#allocation12], 0 }
   0x4   :  { %18 = vsyncpa [#allocation4], 0  ;;  %s1268_s30 = smov [#allocation5]   ;;  %s1269_s11 = smov [#allocation8]  }
   0x5   :  { %s36_s10 = sshll.u32 %s1268_s30, 4  ;;  %s62_s12 = sshll.u32 %s1269_s11, 4  ;;  %s37_s10 = int_to_ptr.vmem [resolvable:$true] %s36_s10  ;;  %s1333_s12 = int_to_ptr.vmem [resolvable:$true] %s62_s12 }
   0x6   :  { %s1104_s15 = scalar_lea.hbm %s1519_s1, 256 }
   0x7   :  { %p1105_p0 = scmp.ne.s32.totalorder %s1519_s1, %s1104_s15  ;;  %p1108_p1 = scmp.lt.u32.totalorder %s1104_s15, %s1519_s1 }
   0x9   :  { %p1110_p2 = pnand %p1108_p1, %p1105_p0 }
   0xb   :  { %1113 = shalt.err (!%p1110_p2)
}
   0xc   :  { %s1114_s20 = scalar_lea.vmem %s37_s10, 256  ;;  %p1119_p4 = scmp.lt.s32.totalorder %s37_s10, %s37_s10 }
   0xd   :  { %p1115_p3 = scmp.ne.s32.totalorder %s37_s10, %s1114_s20  ;;  %p1120_p5 = scmp.lt.s32.totalorder %s1114_s20, %s1114_s20 }
   0xf   :  { %p1121_p6 = por %p1120_p5, %p1119_p4 }
  0x11   :  { %p1122_p7 = pnand %p1121_p6, %p1115_p3 }
  0x13   :  { %1125 = shalt.err (!%p1122_p7)
}
  0x14   :  { %s1270_s21 = smov 128   ;;  %s1271_s22 = smov 8  }
  0x15   :  { %42 = dma.hbm_to_vmem [thread:$0]  %s1519_s1, 256, %s37_s10, [#allocation6], %s1270_s21, %s1270_s21, %s1271_s22  }
  0x16   :  { %s1126_s27 = scalar_lea.hbm %s1522_s4, 256 }
  0x17   :  { %p1127_p8 = scmp.ne.s32.totalorder %s1522_s4, %s1126_s27  ;;  %p1130_p9 = scmp.lt.u32.totalorder %s1126_s27, %s1522_s4 }
  0x19   :  { %p1132_p10 = pnand %p1130_p9, %p1127_p8 }
  0x1b   :  { %1135 = shalt.err (!%p1132_p10)
}
  0x1c   :  { %s1136_s13 = scalar_lea.vmem %s1333_s12, 256  ;;  %p1141_p12 = scmp.lt.s32.totalorder %s1333_s12, %s1333_s12 }
  0x1d   :  { %p1137_p11 = scmp.ne.s32.totalorder %s1333_s12, %s1136_s13  ;;  %p1142_p13 = scmp.lt.s32.totalorder %s1136_s13, %s1136_s13 }
  0x1f   :  { %p1143_p0 = por %p1142_p13, %p1141_p12 }
  0x21   :  { %p1144_p1 = pnand %p1143_p0, %p1137_p11 }
  0x23   :  { %1147 = shalt.err (!%p1144_p1)
}
  0x24   :  { %68 = dma.hbm_to_vmem [thread:$0]  %s1522_s4, 256, %s1333_s12, [#allocation9], %s1270_s21, %s1270_s21, %s1271_s22  }
  0x25   :  { %s1272_s14 = smov [#allocation2]   ;;  %s1273_s16 = smov [#allocation7]  }
  0x26   :  { %s24_s15 = sshll.u32 %s1272_s14, 4  ;;  %s48_s17 = sshll.u32 %s1273_s16, 4  ;;  %s25_s15 = int_to_ptr.vmem [resolvable:$true] %s24_s15  ;;  %s1370_s17 = int_to_ptr.vmem [resolvable:$true] %s48_s17 }
  0x27   :  { %s1148_s20 = scalar_lea.hbm %s1518_s0, 256 }
  0x28   :  { %p1149_p2 = scmp.ne.s32.totalorder %s1518_s0, %s1148_s20  ;;  %p1152_p3 = scmp.lt.u32.totalorder %s1148_s20, %s1518_s0 }
  0x2a   :  { %p1154_p4 = pnand %p1152_p3, %p1149_p2 }
  0x2c   :  { %1157 = shalt.err (!%p1154_p4)
}
  0x2d   :  { %s1158_s4 = scalar_lea.vmem %s25_s15, 256  ;;  %p1163_p6 = scmp.lt.s32.totalorder %s25_s15, %s25_s15 }
  0x2e   :  { %p1159_p5 = scmp.ne.s32.totalorder %s25_s15, %s1158_s4  ;;  %p1164_p7 = scmp.lt.s32.totalorder %s1158_s4, %s1158_s4 }
  0x30   :  { %p1165_p8 = por %p1164_p7, %p1163_p6 }
  0x32   :  { %p1166_p9 = pnand %p1165_p8, %p1159_p5 }
  0x34   :  { %1169 = shalt.err (!%p1166_p9)
}
  0x35   :  { %30 = dma.hbm_to_vmem [thread:$0]  %s1518_s0, 256, %s25_s15, [#allocation3], %s1270_s21, %s1270_s21, %s1271_s22  }
  0x36   :  { %s1170_s30 = scalar_lea.hbm %s1520_s2, 512 }
  0x37   :  { %p1171_p10 = scmp.ne.s32.totalorder %s1520_s2, %s1170_s30  ;;  %p1174_p11 = scmp.lt.u32.totalorder %s1170_s30, %s1520_s2 }
  0x39   :  { %p1176_p12 = pnand %p1174_p11, %p1171_p10 }
  0x3b   :  { %1179 = shalt.err (!%p1176_p12)
}
  0x3c   :  { %s1180_s14 = scalar_lea.vmem %s1370_s17, 512  ;;  %p1185_p0 = scmp.lt.s32.totalorder %s1370_s17, %s1370_s17 }
  0x3d   :  { %p1181_p13 = scmp.ne.s32.totalorder %s1370_s17, %s1180_s14  ;;  %p1186_p1 = scmp.lt.s32.totalorder %s1180_s14, %s1180_s14 }
  0x3f   :  { %p1187_p2 = por %p1186_p1, %p1185_p0 }
  0x41   :  { %p1188_p3 = pnand %p1187_p2, %p1181_p13 }
  0x43   :  { %1191 = shalt.err (!%p1188_p3)
}
  0x44   :  { %54 = dma.hbm_to_vmem [thread:$0]  %s1520_s2, 512, %s1370_s17, [#allocation6], %s1270_s21, %s1270_s21, %s1271_s22  }
  0x45   :  { %s1274_s16 = smov [#allocation10]   ;;  %s1275_s19 = smov [#allocation11]  }
  0x46   :  { %s74_s18 = sshll.u32 %s1274_s16, 4  ;;  %s86_s20 = sshll.u32 %s1275_s19, 4  ;;  %s75_s18 = int_to_ptr.vmem [resolvable:$true] %s74_s18  ;;  %s1407_s20 = int_to_ptr.vmem [resolvable:$true] %s86_s20 }
  0x47   :  { %s1192_s25 = scalar_lea.hbm %s1523_s5, 512 }
  0x48   :  { %p1193_p4 = scmp.ne.s32.totalorder %s1523_s5, %s1192_s25  ;;  %p1196_p5 = scmp.lt.u32.totalorder %s1192_s25, %s1523_s5 }
  0x4a   :  { %p1198_p6 = pnand %p1196_p5, %p1193_p4 }
  0x4c   :  { %1201 = shalt.err (!%p1198_p6)
}
  0x4d   :  { %s1202_s2 = scalar_lea.vmem %s75_s18, 512  ;;  %p1207_p8 = scmp.lt.s32.totalorder %s75_s18, %s75_s18 }
  0x4e   :  { %p1203_p7 = scmp.ne.s32.totalorder %s75_s18, %s1202_s2  ;;  %p1208_p9 = scmp.lt.s32.totalorder %s1202_s2, %s1202_s2 }
  0x50   :  { %p1209_p10 = por %p1208_p9, %p1207_p8 }
  0x52   :  { %p1210_p11 = pnand %p1209_p10, %p1203_p7 }
  0x54   :  { %1213 = shalt.err (!%p1210_p11)
}
  0x55   :  { %80 = dma.hbm_to_vmem [thread:$0]  %s1523_s5, 512, %s75_s18, [#allocation9], %s1270_s21, %s1270_s21, %s1271_s22  }
  0x56   :  { %s1214_s11 = scalar_lea.hbm %s1524_s6, 512 }
  0x57   :  { %p1215_p12 = scmp.ne.s32.totalorder %s1524_s6, %s1214_s11  ;;  %p1218_p13 = scmp.lt.u32.totalorder %s1214_s11, %s1524_s6 }
  0x59   :  { %p1220_p0 = pnand %p1218_p13, %p1215_p12 }
  0x5b   :  { %1223 = shalt.err (!%p1220_p0)
}
  0x5c   :  { %s1224_s0 = scalar_lea.vmem %s1407_s20, 512  ;;  %p1229_p2 = scmp.lt.s32.totalorder %s1407_s20, %s1407_s20 }
  0x5d   :  { %p1225_p1 = scmp.ne.s32.totalorder %s1407_s20, %s1224_s0  ;;  %p1230_p3 = scmp.lt.s32.totalorder %s1224_s0, %s1224_s0 }
  0x5f   :  { %p1231_p4 = por %p1230_p3, %p1229_p2 }
  0x61   :  { %p1232_p5 = pnand %p1231_p4, %p1225_p1 }
  0x63   :  { %1235 = shalt.err (!%p1232_p5)
}
  0x64   :  { %92 = dma.hbm_to_vmem [thread:$0]  %s1524_s6, 512, %s1407_s20, [#allocation12], %s1270_s21, %s1270_s21, %s1271_s22  }
  0x65   :  { %1258 = dma.done.wait [#allocation3], 256  }
  0x66   :  { %1259 = vsyncadd [#allocation3], 4294967040 }
  0x67   :  { %1260 = dma.done.wait [#allocation6], 768  }
  0x68   :  { %1261 = vsyncadd [#allocation6], 4294966528 }
  0x69   :  { %1262 = dma.done.wait [#allocation9], 768  }
  0x6a   :  { %1263 = vsyncadd [#allocation9], 4294966528 }
  0x6b   :  { %1264 = dma.done.wait [#allocation12], 512  }
  0x6c   :  { %1265 = vsyncadd [#allocation12], 4294966784  ;;  %vm131_vm0 = vcmask 261120   ;;  %v120_v0 = vld [vmem:[#allocation7] sm:$0xff]  ;;  %v121_v1 = vld [vmem:[#allocation7 + $0x8] sm:$0xff]  ;;  %vm221_vm1 = vcmask 130048   ;;  %v216_v19 = vlaneseq }
  0x6d   :  { %v122_v2 = vld [vmem:[#allocation7 + $0x10] sm:$0xff]  ;;  %v1043_v3 = vpack.c.bf16 %v121_v1, %v120_v0  ;;  %v123_v4 = vld [vmem:[#allocation7 + $0x18] sm:$0xff]  ;;  %v115_v5 = vld [vmem:[#allocation2] sm:$0xff]  ;;  %v1276_v12 = vmov 0.0   ;;  %vm1277_vm2 = vmmov 0   ;;  %s1278_s22 = smov 96  }
  0x6e   :  { %v1047_v6 = vpack.c.bf16 %v123_v4, %v122_v2  ;;  %984 = vmatprep.mubr.msk.f32.mxu0 %vm131_vm0, %v115_v5  ;;  %v116_v7 = vld [vmem:[#allocation2 + $0x8] sm:$0xff]  ;;  %v213_v8 = vld [vmem:[#allocation8] sm:$0xff]  ;;  %v117_v10 = vld [vmem:[#allocation5] sm:$0xff]  ;;  %v1457_v20 = vshrl.u32 %v216_v19, 7  ;;  %vm381_vm3 = vcmask 64512   ;;  %s1282_s20 = smov [#allocation13]  }
  0x6f   :  { %1044 = vmatprep.subr.bf16.mxu0 %v1043_v3  ;;  %v214_v9 = vld [vmem:[#allocation8 + $0x8] sm:$0xff]  ;;  %991 = vmatprep.mubr.msk.f32.mxu1 %vm221_vm1, %v117_v10  ;;  %v118_v13 = vld [vmem:[#allocation5 + $0x8] sm:$0xff]  ;;  %v925_v14 = vld [vmem:[%s1521_s3] ss:$0 sm:$0xff]  ;;  %s1279_s3 = smov 64   ;;  %s913_s23 = sshll.u32 %s1282_s20, 4  ;;  %s914_s23 = int_to_ptr.vmem [resolvable:$true] %s913_s23 }
  0x70   :  { %1046 = vmatpush3.bf16.msra.mxu0 %v1043_v3  ;;  %v1051_v11 = vpack.c.bf16 %v214_v9, %v213_v8  ;;  %v218_v21 = vsub.s32 0, %v1457_v20  ;;  %v1463_v22 = vld [vmem:[%s1526_s8] sm:$0x1]  ;;  %v628_v47 = vld [vmem:[#allocation10] sm:$0xff]  ;;  %v629_v48 = vld [vmem:[#allocation10 + $0x8] sm:$0xff]  ;;  %vm905_vm5 = vcmask 122880   ;;  %p1241_p7 = scmp.lt.s32.totalorder %s914_s23, %s914_s23 }
  0x71   :  { %1048 = vmatprep.subr.bf16.mxu0 %v1047_v6  ;;  %v1055_v49 = vpack.c.bf16 %v629_v48, %v628_v47  ;;  %v630_v57 = vld [vmem:[#allocation10 + $0x10] sm:$0xff]  ;;  %v631_v58 = vld [vmem:[#allocation10 + $0x18] sm:$0xff]  ;;  %v718_v60 = vld [vmem:[#allocation11] sm:$0xff]  ;;  %s1240_s24 = scalar_lea.vmem %s914_s23, 32 }
  0x72   :  { %1052 = vmatprep.subr.bf16.mxu1 %v1051_v11  ;;  %v1468_v23 = vrot.slane %v1463_v22, %v218_v21  ;;  %v1059_v59 = vpack.c.bf16 %v631_v58, %v630_v57  ;;  %v719_v61 = vld [vmem:[#allocation11 + $0x8] sm:$0xff]  ;;  %v720_v3 = vld [vmem:[#allocation11 + $0x10] sm:$0xff]  ;;  %v721_v4 = vld [vmem:[#allocation11 + $0x18] sm:$0xff] }
  0x73   :  { %1054 = vmatpush3.bf16.msra.mxu1 %v1051_v11  ;;  %v1063_v62 = vpack.c.bf16 %v719_v61, %v718_v60  ;;  %v1067_v5 = vpack.c.bf16 %v721_v4, %v720_v3  ;;  %vm1073_vm4 = vmpackc.low %vm131_vm0, %vm131_vm0 }
  0x74   :  { %1050 = vmatpush3.bf16.msra.mxu0 %v1047_v6  ;;  %994 = vmatprep.subr.mxu1 %v1276_v12 }
  0x75   :  { %999 = vmatprep.subr.mxu0 %v1276_v12 }
  0x76   :  { %992 = vmatmul.mubr.msk.f32.vlgmr.msra.gmra.mrb[0].mxu1 %vm221_vm1, %v118_v13 }
  0x77   :  { %985 = vmatmul.mubr.msk.f32.vlgmr.msra.gmra.mrb[0].mxu0 %vm131_vm0, %v116_v7  ;;  %996 = vmatprep.mubr.msk.f32.mxu1 %vm1277_vm2, %v1276_v12 }
  0x78   :  { %1001 = vmatprep.mubr.msk.f32.mxu0 %vm1277_vm2, %v1276_v12 }
 0x149   :  { %v993_v24 = vpop.f32.mrb[0].mxu1 }
 0x14a   :  { %v986_v15 = vpop.f32.mrb[0].mxu0  ;;  %v294_v25 = vpop.f32.mrb[1].mxu1  ;;  %v300_v54 = vadd.f32 %v993_v24, %v1468_v23 }
 0x14b   :  { %v204_v16 = vpop.f32.mrb[1].mxu0  ;;  %v210_v18 = vadd.f32 %v986_v15, %v925_v14  ;;  %v295_v26 = vadd.f32 %v294_v25, %v1468_v23 }
 0x14c   :  { %v205_v17 = vadd.f32 %v925_v14, %v204_v16  ;;  %v1281_v14 = vmov 96  }
 0x14d   :  { %1000 = vmatpush3.msra.mxu0 %v295_v26  ;;  %1090 = vset.pattern.permute.xlu1 %v1281_v14  ;;  %v808_v26 = vld [vmem:[%s1525_s7] sm:$0x1]  ;;  %s1236_s7 = scalar_lea.vmem %s914_s23, 16 }
 0x14e   :  { %304 = vrot.lane.b32.xlu0 %v205_v17, %s1278_s22  ;;  %1009 = vmatprep.subr.mxu0 %v1276_v12  ;;  %p1237_p6 = scmp.ne.s32.totalorder %s914_s23, %s1236_s7  ;;  %p1242_p8 = scmp.lt.s32.totalorder %s1240_s24, %s1236_s7 }
 0x14f   :  { %1091 = vset.pattern.permute.xlu0 %v1281_v14 }
 0x150   :  { %p1243_p9 = por %p1242_p8, %p1241_p7 }
 0x152   :  { %467 = vrot.lane.b32.xlu0 %v210_v18, %s1278_s22  ;;  %p1244_p10 = pnand %p1243_p9, %p1237_p6 }
 0x1c0   :  { %v305_v27 = vpop.permute.xlu0 %304 }
 0x1c1   :  { %995 = vmatpush3.xpose.msk.msra.mxu1 %vm131_vm0, %v305_v27 }
 0x1c2   :  { %1004 = vmatprep.subr.mxu1 %v1276_v12 }
 0x1c4   :  { %997 = vmatmul.mubr.msk.f32.vlgmr.msra.gmra.mrb[2].mxu1 %vm131_vm0, %v205_v17  ;;  %v468_v28 = vpop.permute.xlu0 %467 }
 0x1c5   :  { %1005 = vmatpush3.xpose.msk.msra.mxu1 %vm131_vm0, %v468_v28  ;;  %1006 = vmatprep.mubr.msk.f32.mxu1 %vm1277_vm2, %v1276_v12 }
 0x1c6   :  { %1056 = vmatprep.subr.bf16.mxu1 %v1055_v49 }
 0x1c8   :  { %1007 = vmatmul.mubr.msk.f32.vlgmr.msra.gmra.mrb[4].mxu1 %vm131_vm0, %v210_v18 }
 0x1c9   :  { %1058 = vmatpush3.bf16.msra.mxu1 %v1055_v49 }
 0x1ca   :  { %1060 = vmatprep.subr.bf16.mxu1 %v1059_v59 }
 0x1cd   :  { %1062 = vmatpush3.bf16.msra.mxu1 %v1059_v59 }
 0x297   :  { %v376_v29 = vpop.f32.mrb[2].mxu1 }
 0x298   :  { %v380_v30 = vmul.f32 0.17677669, %v376_v29  ;;  %v998_v31 = vpop.f32.mrb[3].mxu1 }
 0x29a   :  { %v382_v32 = vsel %vm381_vm3, %v380_v30, -inf }
 0x29b   :  { %383 = vmax.xlane.f32.xlu1 %v382_v32  ;;  %v539_v33 = vpop.f32.mrb[4].mxu1 }
 0x29c   :  { %v543_v34 = vmul.f32 0.17677669, %v539_v33  ;;  %v1008_v35 = vpop.f32.mrb[5].mxu1 }
 0x29e   :  { %v544_v36 = vsel %vm381_vm3, %v543_v34, -inf }
 0x29f   :  { %545 = vmax.xlane.f32.xlu1 %v544_v36 }
 0x328   :  { %v384_v37 = vpop.xlane.xlu1 %383 }
 0x329   :  { %v385_v38 = vsub.f32 %v380_v30, %v384_v37 }
 0x32b   :  { %v386_v39 = vmul.f32 1.442695, %v385_v38 }
 0x32c   :  { %v546_v40 = vpop.xlane.xlu1 %545 }
 0x32d   :  { %1092 = vpow2.f32 %v386_v39  ;;  %v547_v41 = vsub.f32 %v543_v34, %v546_v40 }
 0x32f   :  { %v548_v42 = vmul.f32 1.442695, %v547_v41 }
 0x331   :  { %1094 = vpow2.f32 %v548_v42 }
 0x337   :  { %v1093_v43 = vpop.eup %1092 }
 0x338   :  { %v388_v44 = vsel %vm381_vm3, %v1093_v43, 0.0 }
 0x339   :  { %389 = vadd.xlane.f32.xlu0 %v388_v44 }
 0x33b   :  { %v1095_v45 = vpop.eup %1094 }
 0x33c   :  { %v550_v46 = vsel %vm381_vm3, %v1095_v45, 0.0 }
 0x33d   :  { %551 = vadd.xlane.f32.xlu1 %v550_v46 }
 0x34e   :  { %632 = vrot.lane.b32.xlu1 %v1468_v23, %s1278_s22 }
 0x352   :  { %722 = vrot.lane.b32.xlu1 %v1468_v23, %s1279_s3 }
 0x356   :  { %810 = vperm.xlu1 %1090, %v1463_v22  }
 0x3c6   :  { %v390_v50 = vpop.xlane.xlu0 %389 }
 0x3c7   :  { %1096 = vrcp.f32 %v390_v50 }
 0x3ca   :  { %v552_v51 = vpop.xlane.xlu1 %551 }
 0x3cb   :  { %1098 = vrcp.f32 %v552_v51 }
 0x3ce   :  { %v633_v6 = vpop.permute.xlu1 %632 }
 0x3d1   :  { %v1097_v52 = vpop.eup %1096 }
 0x3d2   :  { %v392_v53 = vmul.f32 %v1097_v52, %v1093_v43  ;;  %v723_v15 = vpop.permute.xlu1 %722 }
 0x3d4   :  { %1002 = vmatmul.mubr.msk.f32.vlgmr.msra.gmra.mrb[2].mxu0 %vm381_vm3, %v392_v53 }
 0x3d5   :  { %v1099_v55 = vpop.eup %1098  ;;  %1010 = vmatpush3.msra.mxu0 %v300_v54  ;;  %1011 = vmatprep.mubr.msk.f32.mxu0 %vm1277_vm2, %v1276_v12 }
 0x3d6   :  { %v554_v56 = vmul.f32 %v1099_v55, %v1095_v45  ;;  %1064 = vmatprep.subr.bf16.mxu0 %v1063_v62  ;;  %v811_v27 = vpop.permute.xlu1 %810 }
 0x3d7   :  { %v816_v22 = vrot.slane %v811_v27, %v218_v21 }
 0x3d8   :  { %1012 = vmatmul.mubr.msk.f32.vlgmr.msra.gmra.mrb[4].mxu0 %vm381_vm3, %v554_v56 }
 0x3d9   :  { %1066 = vmatpush3.bf16.msra.mxu0 %v1063_v62 }
 0x3da   :  { %1068 = vmatprep.subr.bf16.mxu0 %v1067_v5 }
 0x3dd   :  { %1070 = vmatpush3.bf16.msra.mxu0 %v1067_v5 }
 0x4a7   :  { %v462_v63 = vpop.f32.mrb[2].mxu0 }
 0x4a8   :  { %v1003_v0 = vpop.f32.mrb[3].mxu0  ;;  %1022 = vmatprep.mubr.msk.f32.mxu1 %vm131_vm0, %v462_v63 }
 0x4ab   :  { %v624_v1 = vpop.f32.mrb[4].mxu0 }
 0x4ac   :  { %v1013_v2 = vpop.f32.mrb[5].mxu0  ;;  %1023 = vmatmul.mubr.msk.f32.vlgmr.msra.gmra.mrb[6].mxu1 %vm131_vm0, %v624_v1 }
 0x4ad   :  { %1040 = vmatprep.mubr.msk.f32.mxu1 %vm1277_vm2, %v1276_v12  ;;  %v1280_v12 = vmov 0.0|0.0  }
 0x4ae   :  { %1071 = vmatprep.subr.bf16.mxu1 %v1280_v12 }
 0x57f   :  { %v1024_v7 = vpop.f32.mrb[6].mxu1 }
 0x580   :  { %v713_v8 = vadd.f32 %v1024_v7, %v633_v6  ;;  %v707_v9 = vpop.f32.mrb[7].mxu1 }
 0x581   :  { %v708_v10 = vadd.f32 %v707_v9, %v633_v6 }
 0x582   :  { %v717_v13 = vmax.f32 %v713_v8, 0.0 }
 0x583   :  { %v716_v11 = vmax.f32 %v708_v10, 0.0 }
 0x585   :  { %1033 = vmatprep.mubr.msk.f32.mxu0 %vm131_vm0, %v716_v11 }
 0x586   :  { %1034 = vmatmul.mubr.msk.f32.vlgmr.msra.gmra.mrb[6].mxu0 %vm131_vm0, %v717_v13 }
 0x659   :  { %v1035_v16 = vpop.f32.mrb[6].mxu0 }
 0x65a   :  { %v803_v17 = vadd.f32 %v1035_v16, %v723_v15  ;;  %v797_v18 = vpop.f32.mrb[7].mxu0 }
 0x65b   :  { %v798_v19 = vadd.f32 %v797_v18, %v723_v15 }
 0x65c   :  { %v807_v23 = vmax.f32 %v803_v17, 0.0 }
 0x65d   :  { %v806_v24 = vmax.f32 %v798_v19, 0.0 }
 0x65f   :  { %v1072_v25 = vpack.c.bf16 %v807_v23, %v806_v24 }
 0x661   :  { %1074 = vmatpush3.bf16.xpose.msk.msra.mxu1 %vm1073_vm4, %v1072_v25 }
 0x668   :  { %1041 = vmatmul.mubr.msk.f32.vlgmr.msra.gmra.mrb[8].mxu1 %vm131_vm0, %v808_v26 }
 0x73b   :  { %v892_v28 = vpop.f32.mrb[8].mxu1 }
 0x73c   :  { %v893_v29 = vadd.f32 %v892_v28, %v816_v22  ;;  %v1042_v30 = vpop.f32.mrb[9].mxu1 }
 0x73e   :  { %v897_v31 = vand.u32 2147483647, %v893_v29  ;;  %v896_v37 = vmax.f32 %v893_v29, 0.0 }
 0x740   :  { %v898_v32 = vsub.f32 0.0, %v897_v31 }
 0x742   :  { %v899_v33 = vmul.f32 1.442695, %v898_v32 }
 0x744   :  { %1100 = vpow2.f32 %v899_v33 }
 0x74e   :  { %v1101_v34 = vpop.eup %1100 }
 0x74f   :  { %v901_v35 = vadd.f32 1.0, %v1101_v34 }
 0x751   :  { %1102 = vlog2.f32 %v901_v35 }
 0x75b   :  { %v1103_v36 = vpop.eup %1102 }
 0x75c   :  { %v903_v38 = vmul.f32 0.6931472, %v1103_v36 }
 0x75e   :  { %v904_v39 = vadd.f32 %v903_v38, %v896_v37 }
 0x760   :  { %906 = vst.msk [vmem:[#allocation13] sm:$0x1] %vm905_vm5, %v904_v39 }
 0x761   :  { %1247 = shalt.err (!%p1244_p10)
}
 0x762   :  { %s1248_s4 = scalar_lea.hbm %s1527_s9, 16 }
 0x763   :  { %p1249_p11 = scmp.ne.s32.totalorder %s1527_s9, %s1248_s4  ;;  %p1252_p12 = scmp.lt.u32.totalorder %s1248_s4, %s1527_s9 }
 0x765   :  { %p1254_p13 = pnand %p1252_p12, %p1249_p11 }
 0x767   :  { %1257 = shalt.err (!%p1254_p13)
}
 0x768   :  { %916 = dma.vmem_to_hbm [thread:$0]  %s914_s23, 16, %s1527_s9, [#allocation4]  }
 0x769   :  { %1266 = dma.done.wait [#allocation4], 16  }
 0x76a   :  { %1267 = vsyncadd [#allocation4], 4294967280 }
 0x76b   :  { %920 = vsyncpa [#allocation3], 1 }
 0x76c   :  { %921 = vsyncpa [#allocation6], 1 }
 0x76d   :  { %922 = vsyncpa [#allocation9], 1 }
 0x76e   :  { %923 = vsyncpa [#allocation12], 1 }
 0x76f   :  { %924 = vsyncpa [#allocation4], 1 }

</bundles_post_ra>
